<compile_context>
chip_gen: v5e
topology: v5e:2x2
jax: 0.10.0
libtpu: 0.0.40
codegen_flags: <defaults>
</compile_context>

<pallas_src>
import functools

import jax
import jax.numpy as jnp
from jax.experimental import pallas as pl
from jax.experimental.pallas import tpu as pltpu


def _round_up(x, m):
    return ((x + m - 1) // m) * m


def _fusion_kernel(text_ref, audio_ref, wt_ref, wa_ref, bias_ref, out_ref, *, hidden):
    bias = bias_ref[...]

    # Per-modality hidden states; the attention score rides along as column H.
    ht_ext = jnp.dot(text_ref[...], wt_ref[...], preferred_element_type=jnp.float32)
    ht_ext = ht_ext + bias[0:1, :]
    ha_ext = jnp.dot(audio_ref[...], wa_ref[...], preferred_element_type=jnp.float32)
    ha_ext = ha_ext + bias[1:2, :]

    ht = ht_ext[:, :hidden]
    ha = ha_ext[:, :hidden]
    s_t = ht_ext[:, hidden:hidden + 1]
    s_a = ha_ext[:, hidden:hidden + 1]

    # Two-element softmax as a sigmoid: one EUP exp + one exact reciprocal.
    # (exp overflow -> inf -> reciprocal 0, which is the correct limit.)
    e = jnp.exp(s_a - s_t)
    w_t = pl.reciprocal(1.0 + e, approx=False)
    w_a = 1.0 - w_t

    out_ref[:, :hidden] = (w_t * ht).astype(out_ref.dtype)
    out_ref[:, hidden:2 * hidden] = (w_a * ha).astype(out_ref.dtype)


def attention_based_fusion(text, audio, params):
    """params: W_t (Dt,H), b_t (1,H), W_a (Da,H), b_a (1,H),
    att_w_t (1,H), att_b_t (1,1), att_w_a (1,H), att_b_a (1,1).
    (Linear weights stored pre-transposed vs PyTorch: hidden = x @ W + b.)"""
    f32 = jnp.float32
    B, Dt = text.shape
    Da = audio.shape[1]
    H = params["W_t"].shape[1]
    N = 2 * H                          # exact module output width (no slice copy)
    Hs = _round_up(H + 1, 128)         # lane-dense slab width; score column = H
    hp = jax.lax.Precision.HIGHEST

    # Fold the attention-score linears into one extra slab column per modality,
    # and their bias path into the bias rows.  (In a real model this packing is
    # done once at parameter-load time, not per call.)
    v_t = jnp.dot(params["W_t"], params["att_w_t"].T, precision=hp)          # (Dt, 1)
    v_a = jnp.dot(params["W_a"], params["att_w_a"].T, precision=hp)          # (Da, 1)
    c_t = jnp.dot(params["b_t"], params["att_w_t"].T, precision=hp) + params["att_b_t"]
    c_a = jnp.dot(params["b_a"], params["att_w_a"].T, precision=hp) + params["att_b_a"]

    wt_slab = jnp.zeros((Dt, Hs), f32).at[:, :H].set(params["W_t"].astype(f32))
    wt_slab = wt_slab.at[:, H:H + 1].set(v_t.astype(f32))
    wa_slab = jnp.zeros((Da, Hs), f32).at[:, :H].set(params["W_a"].astype(f32))
    wa_slab = wa_slab.at[:, H:H + 1].set(v_a.astype(f32))

    bias = jnp.zeros((2, Hs), f32)
    bias = bias.at[0, :H].set(params["b_t"][0].astype(f32))
    bias = bias.at[0, H].set(c_t[0, 0].astype(f32))
    bias = bias.at[1, :H].set(params["b_a"][0].astype(f32))
    bias = bias.at[1, H].set(c_a[0, 0].astype(f32))

    text = text.astype(f32)
    audio = audio.astype(f32)

    # Row tile: 8-aligned, ~256 rows max, >=2 grid blocks when B allows it
    # (so v7x megacore actually shards the "parallel" axis).
    if B <= 8:
        tb = B
    else:
        nblk = max(2, -(-B // 256))
        tb = _round_up(-(-B // nblk), 8)
    B_pad = _round_up(B, tb)
    if B_pad != B:
        pad = B_pad - B
        text = jnp.pad(text, ((0, pad), (0, 0)))
        audio = jnp.pad(audio, ((0, pad), (0, 0)))
    grid = (B_pad // tb,)

    # Scoped-VMEM budget from the actual buffers (x2 for double buffering),
    # with headroom for compiler scratch.
    vmem_bytes = 4 * (2 * tb * (Dt + Da + N) + 2 * (Dt + Da + 2) * Hs)
    vmem_limit = int(min(96 * 1024 * 1024, max(4 * 1024 * 1024, 2 * vmem_bytes)))

    out = pl.pallas_call(
        functools.partial(_fusion_kernel, hidden=H),
        out_shape=jax.ShapeDtypeStruct((B_pad, N), f32),
        grid=grid,
        in_specs=[
            pl.BlockSpec((tb, Dt), lambda i: (i, 0)),
            pl.BlockSpec((tb, Da), lambda i: (i, 0)),
            pl.BlockSpec((Dt, Hs), lambda i: (0, 0)),   # weights stay VMEM-resident
            pl.BlockSpec((Da, Hs), lambda i: (0, 0)),
            pl.BlockSpec((2, Hs), lambda i: (0, 0)),
        ],
        out_specs=pl.BlockSpec((tb, N), lambda i: (i, 0)),
        compiler_params=pltpu.CompilerParams(
            dimension_semantics=("parallel",),
            vmem_limit_bytes=vmem_limit,
        ),
    )(text, audio, wt_slab, wa_slab, bias)

    return out[:B] if B_pad != B else out


def _reference(text, audio, p):
    hp = jax.lax.Precision.HIGHEST
    th = jnp.dot(text, p["W_t"], precision=hp) + p["b_t"]
    ah = jnp.dot(audio, p["W_a"], precision=hp) + p["b_a"]
    st = jnp.dot(th, p["att_w_t"].T, precision=hp) + p["att_b_t"]
    sa = jnp.dot(ah, p["att_w_a"].T, precision=hp) + p["att_b_a"]
    scores = jnp.concatenate([st, sa], axis=1)
    w = jax.nn.softmax(scores, axis=1)
    return jnp.concatenate([w[:, 0:1] * th, w[:, 1:2] * ah], axis=1)


if __name__ == "__main__":
    # 2H = 128 -> lane-dense output width, no padding anywhere in this config.
    B, TEXT_DIM, AUDIO_DIM, HIDDEN = 8, 16, 24, 64

    key = jax.random.PRNGKey(0)
    keys = jax.random.split(key, 10)

    params = {
        "W_t": jax.random.normal(keys[0], (TEXT_DIM, HIDDEN), jnp.float32) * 0.1,
        "b_t": jax.random.normal(keys[1], (1, HIDDEN), jnp.float32) * 0.1,
        "W_a": jax.random.normal(keys[2], (AUDIO_DIM, HIDDEN), jnp.float32) * 0.1,
        "b_a": jax.random.normal(keys[3], (1, HIDDEN), jnp.float32) * 0.1,
        "att_w_t": jax.random.normal(keys[4], (1, HIDDEN), jnp.float32) * 0.1,
        "att_b_t": jax.random.normal(keys[5], (1, 1), jnp.float32) * 0.1,
        "att_w_a": jax.random.normal(keys[6], (1, HIDDEN), jnp.float32) * 0.1,
        "att_b_a": jax.random.normal(keys[7], (1, 1), jnp.float32) * 0.1,
    }

    text = jax.random.normal(keys[8], (B, TEXT_DIM), jnp.float32)
    audio = jax.random.normal(keys[9], (B, AUDIO_DIM), jnp.float32)

    out = attention_based_fusion(text, audio, params)
    out = jax.block_until_ready(out)

    ref = _reference(text, audio, params)
    assert out.shape == (B, 2 * HIDDEN)
    assert jnp.allclose(out, ref, atol=1e-4, rtol=1e-4), "mismatch vs JAX reference"

    print("KERNEL_OK")
</pallas_src>

<mosaic_0001>
module attributes {stable_mosaic.version = 11 : i64} {
  func.func @_fusion_kernel(%arg0: i32, %arg1: memref<8x16xf32, #tpu.memory_space<vmem>>, %arg2: memref<8x24xf32, #tpu.memory_space<vmem>>, %arg3: memref<16x128xf32, #tpu.memory_space<vmem>>, %arg4: memref<24x128xf32, #tpu.memory_space<vmem>>, %arg5: memref<2x128xf32, #tpu.memory_space<vmem>>, %arg6: memref<8x128xf32, #tpu.memory_space<vmem>>) attributes {dimension_semantics = [#tpu.dimension_semantics<parallel>], iteration_bounds = array<i64: 1>, scalar_prefetch = 0 : i64, scratch_operands = 0 : i64, tpu.core_type = #tpu.core_type<tc>, window_params = [{transform_indices = @transform_0, window_bounds = array<i64: 8, 16>}, {transform_indices = @transform_1, window_bounds = array<i64: 8, 24>}, {pipeline_mode = #tpu.pipeline_mode<synchronous>, transform_indices = @transform_2, window_bounds = array<i64: 16, 128>}, {pipeline_mode = #tpu.pipeline_mode<synchronous>, transform_indices = @transform_3, window_bounds = array<i64: 24, 128>}, {pipeline_mode = #tpu.pipeline_mode<synchronous>, transform_indices = @transform_4, window_bounds = array<i64: 2, 128>}, {transform_indices = @transform_5, window_bounds = array<i64: 8, 128>}]} {
    %c0 = arith.constant 0 : index
    %c0_0 = arith.constant 0 : index
    %0 = vector.load %arg5[%c0, %c0_0] : memref<2x128xf32, #tpu.memory_space<vmem>>, vector<2x128xf32>
    %c0_1 = arith.constant 0 : index
    %c0_2 = arith.constant 0 : index
    %1 = vector.load %arg1[%c0_1, %c0_2] : memref<8x16xf32, #tpu.memory_space<vmem>>, vector<8x16xf32>
    %c0_3 = arith.constant 0 : index
    %c0_4 = arith.constant 0 : index
    %2 = vector.load %arg3[%c0_3, %c0_4] : memref<16x128xf32, #tpu.memory_space<vmem>>, vector<16x128xf32>
    %cst = arith.constant dense<0.000000e+00> : vector<8x128xf32>
    %3 = tpu.matmul %1, %2, %cst {dimension_numbers = #tpu.dot_dimension_numbers<[1], [0], [0], [1], [0, 0, 1, 1], [], []>} : vector<8x16xf32>, vector<16x128xf32>, vector<8x128xf32> -> vector<8x128xf32>
    %4 = vector.extract_strided_slice %0 {offsets = [0, 0], sizes = [1, 128], strides = [1, 1]} : vector<2x128xf32> to vector<1x128xf32>
    %5 = vector.broadcast %4 : vector<1x128xf32> to vector<8x128xf32>
    %6 = arith.addf %3, %5 : vector<8x128xf32>
    %c0_5 = arith.constant 0 : index
    %c0_6 = arith.constant 0 : index
    %7 = vector.load %arg2[%c0_5, %c0_6] : memref<8x24xf32, #tpu.memory_space<vmem>>, vector<8x24xf32>
    %c0_7 = arith.constant 0 : index
    %c0_8 = arith.constant 0 : index
    %8 = vector.load %arg4[%c0_7, %c0_8] : memref<24x128xf32, #tpu.memory_space<vmem>>, vector<24x128xf32>
    %cst_9 = arith.constant dense<0.000000e+00> : vector<8x128xf32>
    %9 = tpu.matmul %7, %8, %cst_9 {dimension_numbers = #tpu.dot_dimension_numbers<[1], [0], [0], [1], [0, 0, 1, 1], [], []>} : vector<8x24xf32>, vector<24x128xf32>, vector<8x128xf32> -> vector<8x128xf32>
    %10 = vector.extract_strided_slice %0 {offsets = [1, 0], sizes = [1, 128], strides = [1, 1]} : vector<2x128xf32> to vector<1x128xf32>
    %11 = vector.broadcast %10 : vector<1x128xf32> to vector<8x128xf32>
    %12 = arith.addf %9, %11 : vector<8x128xf32>
    %13 = vector.extract_strided_slice %6 {offsets = [0, 0], sizes = [8, 64], strides = [1, 1]} : vector<8x128xf32> to vector<8x64xf32>
    %14 = vector.extract_strided_slice %12 {offsets = [0, 0], sizes = [8, 64], strides = [1, 1]} : vector<8x128xf32> to vector<8x64xf32>
    %15 = vector.extract_strided_slice %6 {offsets = [0, 64], sizes = [8, 1], strides = [1, 1]} : vector<8x128xf32> to vector<8x1xf32>
    %16 = vector.extract_strided_slice %12 {offsets = [0, 64], sizes = [8, 1], strides = [1, 1]} : vector<8x128xf32> to vector<8x1xf32>
    %17 = arith.subf %16, %15 : vector<8x1xf32>
    %18 = math.exp %17 : vector<8x1xf32>
    %cst_10 = arith.constant 1.000000e+00 : f32
    %19 = vector.broadcast %cst_10 : f32 to vector<8x1xf32>
    %20 = arith.addf %19, %18 : vector<8x1xf32>
    %21 = tpu.reciprocal %20 : vector<8x1xf32> -> vector<8x1xf32>
    %cst_11 = arith.constant 1.000000e+00 : f32
    %22 = vector.broadcast %cst_11 : f32 to vector<8x1xf32>
    %23 = arith.subf %22, %21 : vector<8x1xf32>
    %24 = vector.broadcast %21 : vector<8x1xf32> to vector<8x64xf32>
    %25 = arith.mulf %24, %13 : vector<8x64xf32>
    %c0_12 = arith.constant 0 : index
    %c0_13 = arith.constant 0 : index
    %26 = vector.load %arg6[%c0_12, %c0_13] : memref<8x128xf32, #tpu.memory_space<vmem>>, vector<8x64xf32>
    tpu.vector_store %arg6[%c0_12, %c0_13], %25 {strides = array<i32>} : memref<8x128xf32, #tpu.memory_space<vmem>>, vector<8x64xf32>,
    %27 = vector.broadcast %23 : vector<8x1xf32> to vector<8x64xf32>
    %28 = arith.mulf %27, %14 : vector<8x64xf32>
    %c0_14 = arith.constant 0 : index
    %c64 = arith.constant 64 : index
    %29 = vector.load %arg6[%c0_14, %c64] : memref<8x128xf32, #tpu.memory_space<vmem>>, vector<8x64xf32>
    tpu.vector_store %arg6[%c0_14, %c64], %28 {strides = array<i32>} : memref<8x128xf32, #tpu.memory_space<vmem>>, vector<8x64xf32>,
    return
  }
  func.func @transform_0(%arg0: i32) -> (i32, i32) {
    %c0_i32 = arith.constant 0 : i32
    %c0_i32_0 = arith.constant 0 : i32
    return %arg0, %c0_i32 : i32, i32
  }
  func.func @transform_1(%arg0: i32) -> (i32, i32) {
    %c0_i32 = arith.constant 0 : i32
    %c0_i32_0 = arith.constant 0 : i32
    return %arg0, %c0_i32 : i32, i32
  }
  func.func @transform_2(%arg0: i32) -> (i32, i32) {
    %c0_i32 = arith.constant 0 : i32
    %c0_i32_0 = arith.constant 0 : i32
    %c0_i32_1 = arith.constant 0 : i32
    return %c0_i32, %c0_i32_0 : i32, i32
  }
  func.func @transform_3(%arg0: i32) -> (i32, i32) {
    %c0_i32 = arith.constant 0 : i32
    %c0_i32_0 = arith.constant 0 : i32
    %c0_i32_1 = arith.constant 0 : i32
    return %c0_i32, %c0_i32_0 : i32, i32
  }
  func.func @transform_4(%arg0: i32) -> (i32, i32) {
    %c0_i32 = arith.constant 0 : i32
    %c0_i32_0 = arith.constant 0 : i32
    %c0_i32_1 = arith.constant 0 : i32
    return %c0_i32, %c0_i32_0 : i32, i32
  }
  func.func @transform_5(%arg0: i32) -> (i32, i32) {
    %c0_i32 = arith.constant 0 : i32
    %c0_i32_0 = arith.constant 0 : i32
    return %arg0, %c0_i32 : i32, i32
  }
}

</mosaic_0001>

<bundles_post_ra>
// kernel: tpu_custom_call.1
= control target key start
LH: loop header
LB: loop body
LE: loop exit
PB: predicated region body
PF: predicated region fallthrough
CT: control target
= control target key end

     0   :  { %10 = vsyncpa [#allocation3], 0  ;;  %s397_s0 = inlined_call_operand.hbm [shape: f32[8,16], index: 0, kind: input, shape index: {}]   ;;  %s398_s1 = inlined_call_operand.hbm [shape: f32[8,24], index: 1, kind: input, shape index: {}]   ;;  %s399_s2 = inlined_call_operand.hbm [shape: f32[16,128], index: 2, kind: input, shape index: {}]   ;;  %s400_s3 = inlined_call_operand.hbm [shape: f32[24,128], index: 3, kind: input, shape index: {}]   ;;  %s401_s4 = inlined_call_operand.vmem [shape: f32[2,128], index: 4, kind: input, shape index: {}]   ;;  %s402_s5 = inlined_call_operand.hbm [shape: f32[8,128], index: 5, kind: output, shape index: {}]  }
   0x1   :  { %11 = vsyncpa [#allocation6], 0 }
   0x2   :  { %12 = vsyncpa [#allocation9], 0  ;;  %s30_s20 = sshll.u32 %s398_s1, 4  ;;  %s31_s20 = int_to_ptr.hbm [resolvable:$true] %s30_s20 }
   0x3   :  { %13 = vsyncpa [#allocation4], 0  ;;  %s340_s21 = smov [#allocation5]   ;;  %s19_s25 = sshll.u32 %s397_s0, 4  ;;  %s20_s25 = int_to_ptr.hbm [resolvable:$true] %s19_s25 }
   0x4   :  { %s32_s22 = sshll.u32 %s340_s21, 4  ;;  %s341_s26 = smov [#allocation2]   ;;  %s33_s22 = int_to_ptr.vmem [resolvable:$true] %s32_s22 }
   0x5   :  { %35 = dma.hbm_to_vmem [thread:$0]  %s31_s20, 128, %s33_s22, [#allocation6]  }
   0x6   :  { %s21_s27 = sshll.u32 %s341_s26, 4  ;;  %s40_s30 = sshll.u32 %s399_s2, 4  ;;  %s22_s27 = int_to_ptr.vmem [resolvable:$true] %s21_s27  ;;  %s41_s30 = int_to_ptr.hbm [resolvable:$true] %s40_s30 }
   0x7   :  { %24 = dma.hbm_to_vmem [thread:$0]  %s20_s25, 128, %s22_s27, [#allocation3]  }
   0x8   :  { %s342_s1 = smov [#allocation7]   ;;  %s53_s9 = sshll.u32 %s400_s3, 4  ;;  %s54_s9 = int_to_ptr.hbm [resolvable:$true] %s53_s9 }
   0x9   :  { %s42_s6 = sshll.u32 %s342_s1, 4  ;;  %s343_s10 = smov 128   ;;  %s43_s6 = int_to_ptr.vmem [resolvable:$true] %s42_s6 }
   0xa   :  { %s344_s0 = smov 8   ;;  %s345_s11 = smov [#allocation8]  }
   0xb   :  { %48 = dma.hbm_to_vmem [thread:$0]  %s41_s30, 256, %s43_s6, [#allocation6], %s343_s10, %s343_s10, %s344_s0  }
   0xc   :  { %s55_s12 = sshll.u32 %s345_s11, 4  ;;  %s56_s12 = int_to_ptr.vmem [resolvable:$true] %s55_s12 }
   0xd   :  { %61 = dma.hbm_to_vmem [thread:$0]  %s54_s9, 384, %s56_s12, [#allocation9], %s343_s10, %s343_s10, %s344_s0  }
   0xe   :  { %332 = dma.done.wait [#allocation3], 128  }
   0xf   :  { %333 = vsyncadd [#allocation3], 4294967168 }
  0x10   :  { %334 = dma.done.wait [#allocation6], 384  }
  0x11   :  { %335 = vsyncadd [#allocation6], 4294966912 }
  0x12   :  { %336 = dma.done.wait [#allocation9], 384  }
  0x13   :  { %337 = vsyncadd [#allocation9], 4294966912  ;;  %v112_v0 = vld [vmem:[#allocation8 + $0x10] sm:$0xff]  ;;  %v83_v1 = vld [vmem:[#allocation7 + $0x8] sm:$0xff]  ;;  %vm85_vm0 = vcmask 130048   ;;  %vm114_vm1 = vcmask 195584  }
  0x14   :  { %v111_v2 = vld [vmem:[#allocation8 + $0x8] sm:$0xff]  ;;  %131 = vmatpush.msra.mxu1 %v112_v0  ;;  %103 = vmatpush.msra.mxu0 %v83_v1  ;;  %v82_v3 = vld [vmem:[#allocation7] sm:$0xff]  ;;  %v81_v4 = vld [vmem:[#allocation2] sm:$0xff]  ;;  %v346_v7 = vmov 64   ;;  %vm163_vm6 = vcmask 523264   ;;  %s348_s13 = smov [#allocation10]  }
  0x15   :  { %v110_v5 = vld [vmem:[#allocation8] sm:$0xff]  ;;  %v109_v6 = vld [vmem:[#allocation5] sm:$0xff]  ;;  %207 = vset.pattern.permute.xlu0 %v346_v7  ;;  %s182_s14 = sshll.u32 %s348_s13, 4  ;;  %s184_s17 = sshll.u32 %s402_s5, 4  ;;  %vm175_vm7 = vcmask 1048064   ;;  %s183_s14 = int_to_ptr.vmem [resolvable:$true] %s182_s14  ;;  %s185_s17 = int_to_ptr.hbm [resolvable:$true] %s184_s17 }
  0x16   :  { %132 = vmatpush.msra.mxu1 %v111_v2  ;;  %104 = vmatpush.msra.mxu0 %v82_v3  ;;  %v80_v8 = vld [vmem:[%s401_s4] sm:$0x3]  ;;  %s347_s4 = smov 64  }
  0x17   :  { %196 = vmatmul.msk.f32.vlgmr.msra.gmra.mxu0 %vm85_vm0, %v81_v4  ;;  %v84_v9 = vperm.slane %v80_v8, 0  ;;  %v113_v10 = vperm.slane %v80_v8, 1 }
  0x18   :  { %133 = vmatpush.msra.mxu1 %v110_v5 }
  0x19   :  { %197 = vmatmul.msk.f32.vlgmr.msra.gmra.mxu1 %vm114_vm1, %v109_v6 }
  0x94   :  { %v106_v11 = vpop.f32.mrf.mxu0 }
  0x95   :  { %v107_v12 = vadd.f32 %v106_v11, %v84_v9 }
  0x96   :  { %v135_v13 = vpop.f32.mrf.mxu1 }
  0x97   :  { %v136_v14 = vadd.f32 %v135_v13, %v113_v10 }
  0x99   :  { %v138_v15 = vsub.f32 %v136_v14, %v107_v12 }
  0x9b   :  { %v139_v16 = vmul.f32 1.442695, %v138_v15 }
  0x9d   :  { %208 = vpow2.f32 %v139_v16 }
  0xa3   :  { %v209_v17 = vpop.eup %208 }
  0xa4   :  { %v141_v18 = vadd.f32 1.0, %v209_v17 }
  0xa6   :  { %210 = vrcp.f32 %v141_v18  ;;  %v153_v22 = vand.u32 2147483648, %v141_v18  ;;  %v151_v24 = vand.u32 2147483647, %v141_v18  ;;  %vm147_vm3 = vweird.f32 %v141_v18 }
  0xa8   :  { %v154_v26 = vor.u32 1.1754944e-38, %v153_v22  ;;  %vm152_vm5 = vcmp.eq.f32.partialorder %v151_v24, 8.507059e+37 }
  0xac   :  { %v211_v19 = vpop.eup %210 }
  0xad   :  { %v143_v20 = vmul.f32 %v211_v19, %v141_v18  ;;  %vm148_vm2 = vweird.f32 %v211_v19 }
  0xae   :  { %vm149_vm4 = vmor %vm147_vm3, %vm148_vm2 }
  0xaf   :  { %v144_v21 = vsub.f32 1.0, %v143_v20 }
  0xb1   :  { %v145_v23 = vmul.f32 %v211_v19, %v144_v21 }
  0xb3   :  { %v146_v25 = vadd.f32 %v211_v19, %v145_v23 }
  0xb5   :  { %v150_v27 = vsel %vm149_vm4, %v211_v19, %v146_v25 }
  0xb6   :  { %v155_v28 = vsel %vm152_vm5, %v154_v26, %v150_v27 }
  0xb7   :  { %v156_v29 = vsub.f32 1.0, %v155_v28 }
  0xb9   :  { %167 = vperm.xlu0 %207, %v156_v29  }
  0xc1   :  { %159 = vperm.xlu0 %207, %v155_v28  }
 0x12b   :  { %v168_v30 = vpop.permute.xlu0 %167 }
 0x12c   :  { %v170_v31 = vmul.f32 %v168_v30, %v136_v14 }
 0x12e   :  { %172 = vrot.lane.b32.xlu1 %v170_v31, %s347_s4 }
 0x133   :  { %v160_v32 = vpop.permute.xlu0 %159 }
 0x134   :  { %v162_v33 = vmul.f32 %v160_v32, %v107_v12 }
 0x136   :  { %164 = vst.msk [vmem:[#allocation10] sm:$0xff] %vm163_vm6, %v162_v33 }
 0x1a0   :  { %v173_v34 = vpop.permute.xlu1 %172 }
 0x1a1   :  { %176 = vst.msk [vmem:[#allocation10] sm:$0xff] %vm175_vm7, %v173_v34 }
 0x1a2   :  { %187 = dma.vmem_to_hbm [thread:$0]  %s183_s14, 128, %s185_s17, [#allocation4]  }
 0x1a3   :  { %338 = dma.done.wait [#allocation4], 128  }
 0x1a4   :  { %339 = vsyncadd [#allocation4], 4294967168 }
 0x1a5   :  { %192 = vsyncpa [#allocation3], 1 }
 0x1a6   :  { %193 = vsyncpa [#allocation6], 1 }
 0x1a7   :  { %194 = vsyncpa [#allocation9], 1 }
 0x1a8   :  { %195 = vsyncpa [#allocation4], 1 }

</bundles_post_ra>
